<compile_context>
chip_gen: v6e
topology: v6e:2x2x1
jax: 0.10.0
libtpu: 0.0.40
codegen_flags: <defaults>
</compile_context>

<pallas_src>
import functools
import math

import numpy as np
import jax
import jax.numpy as jnp
from jax.experimental import pallas as pl
from jax.experimental.pallas import tpu as pltpu


# ----------------------------------------------------------------------------
# Kernel: per-block partial sum of |x - target| * mask * w over flattened (t,d)
# ----------------------------------------------------------------------------
def _l1_masked_partial_kernel(x_ref, t_ref, lend_ref, w_ref, out_ref, *, chunk):
    j = pl.program_id(1)                          # chunk index along T*D
    x = x_ref[...].astype(jnp.float32)            # (bb, C)
    t = t_ref[...].astype(jnp.float32)            # (bb, C)
    lend = lend_ref[...]                          # (bb, 1) int32: min(len,T)*D
    w = w_ref[...]                                # (bb, 1) f32 per-batch weight
    bb, c = x.shape

    # Mask over the flattened (t, d) axis is prefix-contiguous, so one compare
    # against len*D suffices. It also zeroes padding of the boundary chunk
    # (padded flat indices are >= T*D >= len*D).
    f_idx = jax.lax.broadcasted_iota(jnp.int32, (bb, c), 1) + j * chunk
    mask = f_idx < lend                           # (bb, C)

    absdiff = jnp.abs(x - t)
    masked = jnp.where(mask, absdiff, 0.0)
    row = jnp.sum(masked, axis=1, keepdims=True)  # (bb, 1) per-row sums (XLU)
    out_ref[...] = jnp.sum(row * w).reshape(1, 1, 1, 1)


# ----------------------------------------------------------------------------
# Block-size selection
# ----------------------------------------------------------------------------
def _round_up(v, m):
    return ((v + m - 1) // m) * m


def _choose_blocks(B, F, itemsize, block_c, target_bytes):
    # Sublane block dim: multiple of 8 (16 for sub-32-bit packing) or full B.
    sub = 16 if itemsize < 4 else 8
    if B % sub == 0:
        bb = sub
    elif B % 8 == 0:
        bb = 8
    else:
        bb = B
    nb = max(1, B // bb)

    if block_c is not None:
        C = int(block_c)
    else:
        cap = target_bytes // max(1, bb * itemsize)
        if cap >= F:
            C = F
        else:
            C = max(128, (cap // 128) * 128)
            # Best effort: make the total parallel grid even so both v7x
            # TensorCores stay busy (no effect on single-TC v5e/v6e).
            nc = math.ceil(F / C)
            if nc > 1 and (nb * nc) % 2 == 1:
                c2 = _round_up(math.ceil(F / (nc + 1)), 128)
                if 128 <= c2 <= C and (nb * math.ceil(F / c2)) % 2 == 0:
                    C = c2
    if C != F:
        assert C % 128 == 0, "flattened chunk must be a multiple of 128 lanes"
    return bb, C


# ----------------------------------------------------------------------------
# Wrapper
# ----------------------------------------------------------------------------
def l1_loss_masked(x, target, length, *, seq_len_norm=False, block_c=None,
                   target_block_bytes=4 << 20):
    """Pallas TPU forward pass of L1LossMasked."""
    B, T, D = x.shape
    F = T * D
    itemsize = jnp.dtype(x.dtype).itemsize

    # Per-batch scalar glue from `length` (replaces in-kernel mask reductions).
    lens_c = jnp.minimum(length.astype(jnp.int32), jnp.int32(T))        # (B,)
    lens_f = lens_c.astype(jnp.float32)
    if seq_len_norm:
        # TODO(synk): length == 0 gives Inf/NaN here, matching a naive PyTorch
        # port of the module; callers must pass positive lengths.
        w = 1.0 / (lens_f * jnp.float32(B * D))                         # (B,)
    else:
        w = jnp.broadcast_to(1.0 / (jnp.sum(lens_f) * jnp.float32(D)), (B,))
    lend = (lens_c * jnp.int32(D)).reshape(B, 1)
    w = w.astype(jnp.float32).reshape(B, 1)

    # Free reshape of contiguous data: flatten (T, D) onto the lane axis so
    # DMAs are lane-dense regardless of D (no 80/32-lane waste, no stride).
    x2 = x.reshape(B, F)
    t2 = target.reshape(B, F)

    bb, C = _choose_blocks(B, F, itemsize, block_c, target_block_bytes)
    nb = B // bb
    nc = pl.cdiv(F, C)

    # Double-buffered footprint: 2 inputs x 2 buffers x block (+ small extras).
    in_block_bytes = bb * C * itemsize
    vmem_limit = int(min(40 << 20, max(24 << 20, 4 * in_block_bytes + (4 << 20))))

    partials = pl.pallas_call(
        functools.partial(_l1_masked_partial_kernel, chunk=C),
        out_shape=jax.ShapeDtypeStruct((nb, nc, 1, 1), jnp.float32),
        grid=(nb, nc),
        in_specs=[
            pl.BlockSpec((bb, C), lambda i, j: (i, j)),      # x   (flattened)
            pl.BlockSpec((bb, C), lambda i, j: (i, j)),      # target
            pl.BlockSpec((bb, 1), lambda i, j: (i, 0)),      # min(len,T) * D
            pl.BlockSpec((bb, 1), lambda i, j: (i, 0)),      # weights
        ],
        out_specs=pl.BlockSpec((1, 1, 1, 1), lambda i, j: (i, j, 0, 0)),
        compiler_params=pltpu.CompilerParams(
            dimension_semantics=("parallel", "parallel"),
            vmem_limit_bytes=vmem_limit),
    )(x2, t2, lend, w)

    # Tiny (nb, nc) partial-sum reduction in the wrapper.
    return jnp.sum(partials)


class L1LossMaskedPallas:
    """Pallas TPU port of layers/losses.py::L1LossMasked (forward only)."""

    def __init__(self, seq_len_norm):
        self.seq_len_norm = bool(seq_len_norm)

    def __call__(self, x, target, length):
        return l1_loss_masked(x, target, length, seq_len_norm=self.seq_len_norm)


# ----------------------------------------------------------------------------
# Pure-JAX reference (mirrors the PyTorch module) for a silent sanity check
# ----------------------------------------------------------------------------
def _ref_l1_masked(x, target, lengths, seq_len_norm):
    B, T, D = x.shape
    mask = (jnp.arange(T)[None, :] < lengths[:, None]).astype(jnp.float32)
    mask = mask[:, :, None]                                  # (B, T, 1)
    if seq_len_norm:
        norm_w = mask / jnp.sum(mask, axis=1, keepdims=True)
        out_weights = norm_w / (B * D)
        l = jnp.abs(x * mask - target * mask)
        return jnp.sum(l * out_weights)
    mask_e = jnp.broadcast_to(mask, x.shape)
    l = jnp.sum(jnp.abs(x * mask_e - target * mask_e))
    return l / jnp.sum(mask_e)


if __name__ == "__main__":
    key = jax.random.PRNGKey(0)

    # Primary small case (single block, bb == B < 8).
    B, T, D = 2, 16, 32
    k1, k2 = jax.random.split(key)
    x = jax.random.normal(k1, (B, T, D), jnp.float32)
    tgt = jax.random.normal(k2, (B, T, D), jnp.float32)
    lengths = jnp.array([16, 9], jnp.int32)
    for sln in (False, True):
        mod = L1LossMaskedPallas(seq_len_norm=sln)
        out = jax.block_until_ready(mod(x, tgt, lengths))
        ref = _ref_l1_masked(x, tgt, lengths, sln)
        np.testing.assert_allclose(np.asarray(out), np.asarray(ref),
                                   rtol=1e-5, atol=1e-6)

    # Tiled f32 case exercising the (batch, chunk) grid and a partially padded
    # boundary chunk (T*D = 480 not a multiple of block_c = 128).
    B2, T2, D2 = 16, 20, 24
    k3, k4, k5 = jax.random.split(key, 3)
    x2 = jax.random.normal(k3, (B2, T2, D2), jnp.float32)
    t2 = jax.random.normal(k4, (B2, T2, D2), jnp.float32)
    lengths2 = jax.random.randint(k5, (B2,), 1, T2 + 1).astype(jnp.int32)
    for sln in (False, True):
        out = jax.block_until_ready(
            l1_loss_masked(x2, t2, lengths2, seq_len_norm=sln, block_c=128))
        ref = _ref_l1_masked(x2, t2, lengths2, sln)
        np.testing.assert_allclose(np.asarray(out), np.asarray(ref),
                                   rtol=1e-5, atol=1e-6)

    # Auto block-size path (small budget -> 128-multiple chunks, even grid).
    out = jax.block_until_ready(
        l1_loss_masked(x2, t2, lengths2, seq_len_norm=False,
                       target_block_bytes=8192))
    np.testing.assert_allclose(np.asarray(out),
                               np.asarray(_ref_l1_masked(x2, t2, lengths2, False)),
                               rtol=1e-5, atol=1e-6)

    # bf16 inputs stay bf16 into the kernel (half the HBM bytes); bb=16 packing.
    x3 = x2.astype(jnp.bfloat16)
    t3 = t2.astype(jnp.bfloat16)
    for sln in (False, True):
        out = jax.block_until_ready(
            l1_loss_masked(x3, t3, lengths2, seq_len_norm=sln, block_c=128))
        ref = _ref_l1_masked(x3, t3, lengths2, sln)
        np.testing.assert_allclose(np.asarray(out), np.asarray(ref),
                                   rtol=1e-4, atol=1e-6)

    print("KERNEL_OK")
</pallas_src>

<mosaic_0001>
module attributes {stable_mosaic.version = 11 : i64} {
  func.func @_l1_masked_partial_kernel(%arg0: i32, %arg1: i32, %arg2: memref<2x512xf32, #tpu.memory_space<vmem>>, %arg3: memref<2x512xf32, #tpu.memory_space<vmem>>, %arg4: memref<2x1xi32, #tpu.memory_space<vmem>>, %arg5: memref<2x1xf32, #tpu.memory_space<vmem>>, %arg6: memref<1x1x1x1xf32, #tpu.memory_space<vmem>>) attributes {dimension_semantics = [#tpu.dimension_semantics<parallel>, #tpu.dimension_semantics<parallel>], iteration_bounds = array<i64: 1, 1>, scalar_prefetch = 0 : i64, scratch_operands = 0 : i64, tpu.core_type = #tpu.core_type<tc>, window_params = [{transform_indices = @transform_0, window_bounds = array<i64: 2, 512>}, {transform_indices = @transform_1, window_bounds = array<i64: 2, 512>}, {transform_indices = @transform_2, window_bounds = array<i64: 2, 1>}, {transform_indices = @transform_3, window_bounds = array<i64: 2, 1>}, {transform_indices = @transform_4, window_bounds = array<i64: 1, 1, 1, 1>}]} {
    %c0 = arith.constant 0 : index
    %c0_0 = arith.constant 0 : index
    %0 = vector.load %arg2[%c0, %c0_0] : memref<2x512xf32, #tpu.memory_space<vmem>>, vector<2x512xf32>
    %c0_1 = arith.constant 0 : index
    %c0_2 = arith.constant 0 : index
    %1 = vector.load %arg3[%c0_1, %c0_2] : memref<2x512xf32, #tpu.memory_space<vmem>>, vector<2x512xf32>
    %c0_3 = arith.constant 0 : index
    %c0_4 = arith.constant 0 : index
    %2 = vector.load %arg4[%c0_3, %c0_4] : memref<2x1xi32, #tpu.memory_space<vmem>>, vector<2x1xi32>
    %c0_5 = arith.constant 0 : index
    %c0_6 = arith.constant 0 : index
    %3 = vector.load %arg5[%c0_5, %c0_6] : memref<2x1xf32, #tpu.memory_space<vmem>>, vector<2x1xf32>
    %4 = tpu.iota {dimensions = array<i32: 1>} : vector<2x512xi32>
    %c512_i32 = arith.constant 512 : i32
    %5 = arith.muli %arg1, %c512_i32 : i32
    %6 = vector.broadcast %5 : i32 to vector<2x512xi32>
    %7 = arith.addi %4, %6 : vector<2x512xi32>
    %8 = vector.broadcast %2 : vector<2x1xi32> to vector<2x512xi32>
    %9 = arith.cmpi slt, %7, %8 : vector<2x512xi32>
    %10 = arith.subf %0, %1 : vector<2x512xf32>
    %11 = math.absf %10 : vector<2x512xf32>
    %cst = arith.constant 0.000000e+00 : f32
    %12 = vector.broadcast %cst : f32 to vector<2x512xf32>
    %13 = arith.select %9, %11, %12 : vector<2x512xi1>, vector<2x512xf32>
    %cst_7 = arith.constant dense<0.000000e+00> : vector<2xf32>
    %14 = vector.multi_reduction <add>, %13, %cst_7 [1] : vector<2x512xf32> to vector<2xf32>
    %15 = vector.shape_cast %14 : vector<2xf32> to vector<2x1xf32>
    %16 = arith.mulf %15, %3 : vector<2x1xf32>
    %17 = vector.shape_cast %16 : vector<2x1xf32> to vector<1x2x1xf32>
    %cst_8 = arith.constant dense<0.000000e+00> : vector<1xf32>
    %18 = vector.multi_reduction <add>, %17, %cst_8 [1, 2] : vector<1x2x1xf32> to vector<1xf32>
    %19 = vector.shape_cast %18 : vector<1xf32> to vector<1x1x1xf32>
    %20 = vector.extract %19[0, 0, 0] : f32 from vector<1x1x1xf32>
    %21 = vector.broadcast %20 : f32 to vector<1x1x1x1xf32>
    %c0_9 = arith.constant 0 : index
    %c0_10 = arith.constant 0 : index
    %c0_11 = arith.constant 0 : index
    %c0_12 = arith.constant 0 : index
    %22 = vector.load %arg6[%c0_9, %c0_10, %c0_11, %c0_12] : memref<1x1x1x1xf32, #tpu.memory_space<vmem>>, vector<1x1x1x1xf32>
    tpu.vector_store %arg6[%c0_9, %c0_10, %c0_11, %c0_12], %21 {strides = array<i32>} : memref<1x1x1x1xf32, #tpu.memory_space<vmem>>, vector<1x1x1x1xf32>,
    return
  }
  func.func @transform_0(%arg0: i32, %arg1: i32) -> (i32, i32) {
    %c0_i32 = arith.constant 0 : i32
    return %arg0, %arg1 : i32, i32
  }
  func.func @transform_1(%arg0: i32, %arg1: i32) -> (i32, i32) {
    %c0_i32 = arith.constant 0 : i32
    return %arg0, %arg1 : i32, i32
  }
  func.func @transform_2(%arg0: i32, %arg1: i32) -> (i32, i32) {
    %c0_i32 = arith.constant 0 : i32
    %c0_i32_0 = arith.constant 0 : i32
    return %arg0, %c0_i32 : i32, i32
  }
  func.func @transform_3(%arg0: i32, %arg1: i32) -> (i32, i32) {
    %c0_i32 = arith.constant 0 : i32
    %c0_i32_0 = arith.constant 0 : i32
    return %arg0, %c0_i32 : i32, i32
  }
  func.func @transform_4(%arg0: i32, %arg1: i32) -> (i32, i32, i32, i32) {
    %c0_i32 = arith.constant 0 : i32
    %c0_i32_0 = arith.constant 0 : i32
    %c0_i32_1 = arith.constant 0 : i32
    return %arg0, %arg1, %c0_i32, %c0_i32_0 : i32, i32, i32, i32
  }
}

</mosaic_0001>

<bundles_post_ra>
// kernel: tpu_custom_call.1
= control target key start
LH: loop header
LB: loop body
LE: loop exit
PB: predicated region body
PF: predicated region fallthrough
CT: control target
= control target key end

     0   :  { %9 = vsyncpa [#allocation3], 0  ;;  %s252_s0 = inlined_call_operand.hbm [shape: f32[2,512], index: 0, kind: input, shape index: {}]   ;;  %s253_s1 = inlined_call_operand.hbm [shape: f32[2,512], index: 1, kind: input, shape index: {}]   ;;  %s254_s2 = inlined_call_operand.vmem [shape: s32[2,1], index: 2, kind: input, shape index: {}]   ;;  %s255_s3 = inlined_call_operand.vmem [shape: f32[2,1], index: 3, kind: input, shape index: {}]   ;;  %s256_s4 = inlined_call_operand.hbm [shape: f32[1,1,1,1], index: 4, kind: output, shape index: {}]  }
   0x1   :  { %10 = vsyncpa [#allocation6], 0 }
   0x2   :  { %11 = vsyncpa [#allocation4], 0  ;;  %s207_s15 = smov [#allocation2]   ;;  %s208_s17 = smov [#allocation5]  }
   0x3   :  { %s18_s16 = sshll.u32 %s207_s15, 4  ;;  %s28_s18 = sshll.u32 %s208_s17, 4  ;;  %s19_s16 = int_to_ptr.vmem [resolvable:$true] %s18_s16  ;;  %s29_s18 = int_to_ptr.vmem [resolvable:$true] %s28_s18 }
   0x4   :  { %s149_s19 = scalar_lea.vmem %s19_s16, 128  ;;  %p154_p1 = scmp.lt.s32.totalorder %s19_s16, %s19_s16 }
   0x5   :  { %p150_p0 = scmp.ne.s32.totalorder %s19_s16, %s149_s19  ;;  %p155_p2 = scmp.lt.s32.totalorder %s149_s19, %s149_s19 }
   0x7   :  { %p156_p3 = por %p155_p2, %p154_p1 }
   0x9   :  { %p157_p4 = pnand %p156_p3, %p150_p0 }
   0xb   :  { %160 = shalt.err (!%p157_p4)
}
   0xc   :  { %21 = dma.hbm_to_vmem [thread:$0]  %s252_s0, 128, %s19_s16, [#allocation3]  }
   0xd   :  { %s169_s22 = scalar_lea.vmem %s29_s18, 128  ;;  %p174_p6 = scmp.lt.s32.totalorder %s29_s18, %s29_s18 }
   0xe   :  { %p170_p5 = scmp.ne.s32.totalorder %s29_s18, %s169_s22  ;;  %p175_p7 = scmp.lt.s32.totalorder %s169_s22, %s169_s22 }
  0x10   :  { %p176_p8 = por %p175_p7, %p174_p6 }
  0x12   :  { %p177_p9 = pnand %p176_p8, %p170_p5 }
  0x14   :  { %180 = shalt.err (!%p177_p9)
}
  0x15   :  { %31 = dma.hbm_to_vmem [thread:$0]  %s253_s1, 128, %s29_s18, [#allocation6]  }
  0x16   :  { %201 = dma.done.wait [#allocation3], 128  }
  0x17   :  { %202 = vsyncadd [#allocation3], 4294967168 }
  0x18   :  { %203 = dma.done.wait [#allocation6], 128  }
  0x19   :  { %204 = vsyncadd [#allocation6], 4294967168  ;;  %v209_v0 = vmov 0   ;;  %v44_v1 = vld [vmem:[%s254_s2] sm:$0x3]  ;;  %v43_v3 = vld [vmem:[#allocation5] sm:$0xff]  ;;  %v46_v4 = vlaneseq }
  0x1a   :  { %140 = vset.pattern.permute.xlu0 %v209_v0  ;;  %v42_v2 = vld [vmem:[#allocation2] sm:$0xff]  ;;  %v210_v5 = vmov 1983009808   ;;  %vm92_vm0 = vcmask 1041408   ;;  %vm103_vm5 = vcmask 1024   ;;  %s211_s2 = smov [#allocation7]  }
  0x1b   :  { %58 = vperm.xlu0 %140, %v44_v1   ;;  %v69_v6 = vunpack.c.l.s4 %v210_v5  ;;  %v64_v7 = vsub.f32 %v42_v2, %v43_v3  ;;  %v72_v9 = vshrl.u32 %v46_v4, 7  ;;  %v47_v13 = vand.u32 127, %v46_v4  ;;  %v45_v33 = vld [vmem:[%s255_s3] sm:$0x3]  ;;  %s123_s27 = sshll.u32 %s211_s2, 4  ;;  %s124_s27 = int_to_ptr.vmem [resolvable:$true] %s123_s27 }
  0x1c   :  { %vm115_vm6 = vcmask 0   ;;  %s181_s3 = scalar_lea.vmem %s124_s27, 16  ;;  %s185_s29 = scalar_lea.vmem %s124_s27, 32 }
  0x1d   :  { %v70_v8 = vunpack.c.0.s8 %v69_v6  ;;  %v65_v10 = vand.u32 2147483647, %v64_v7  ;;  %v48_v16 = vadd.s32 128, %v47_v13  ;;  %v49_v17 = vadd.s32 256, %v47_v13  ;;  %p182_p10 = scmp.ne.s32.totalorder %s124_s27, %s181_s3  ;;  %p186_p11 = scmp.lt.s32.totalorder %s124_s27, %s124_s27 }
  0x1e   :  { %v50_v18 = vadd.s32 384, %v47_v13  ;;  %p187_p12 = scmp.lt.s32.totalorder %s185_s29, %s181_s3 }
  0x1f   :  { %v73_v11 = vsub.s32 %v70_v8, %v72_v9  ;;  %v67_v12 = vcombine.high %v65_v10, %v65_v10 }
  0x20   :  { %p188_p13 = por %p187_p12, %p186_p11 }
  0x21   :  { %v74_v14 = vrot.slane %v65_v10, %v73_v11  ;;  %v81_v15 = vrot.slane %v67_v12, %v73_v11 }
  0x22   :  { %p189_p0 = pnand %p188_p13, %p182_p10 }
  0x23   :  { %v82_v19 = vcombine.high %v74_v14, %v74_v14  ;;  %v83_v21 = vcombine.high %v81_v15, %v81_v15 }
  0x96   :  { %v59_v20 = vpop.permute.xlu0 %58 }
  0x97   :  { %vm60_vm1 = vcmp.lt.s32.totalorder %v47_v13, %v59_v20  ;;  %vm61_vm2 = vcmp.lt.s32.totalorder %v48_v16, %v59_v20  ;;  %vm62_vm3 = vcmp.lt.s32.totalorder %v49_v17, %v59_v20  ;;  %vm63_vm4 = vcmp.lt.s32.totalorder %v50_v18, %v59_v20 }
  0x98   :  { %v88_v22 = vsel %vm60_vm1, %v74_v14, 0.0  ;;  %v89_v23 = vsel %vm61_vm2, %v82_v19, 0.0  ;;  %v90_v24 = vsel %vm62_vm3, %v81_v15, 0.0  ;;  %v91_v27 = vsel %vm63_vm4, %v83_v21, 0.0 }
  0x99   :  { %v93_v25 = vsel %vm92_vm0, %v88_v22, 0.0  ;;  %v94_v26 = vsel %vm92_vm0, %v89_v23, 0.0  ;;  %v96_v29 = vsel %vm92_vm0, %v90_v24, 0.0  ;;  %v98_v31 = vsel %vm92_vm0, %v91_v27, 0.0 }
  0x9a   :  { %v95_v28 = vadd.f32 %v94_v26, %v93_v25 }
  0x9c   :  { %v97_v30 = vadd.f32 %v96_v29, %v95_v28 }
  0x9e   :  { %v99_v32 = vadd.f32 %v98_v31, %v97_v30 }
  0xa0   :  { %100 = vadd.xlane.f32.xlu0 %v99_v32 }
 0x129   :  { %v101_v34 = vpop.xlane.xlu0 %100 }
 0x12a   :  { %v102_v35 = vmul.f32 %v101_v34, %v45_v33 }
 0x12c   :  { %v104_v36 = vsel %vm103_vm5, %v102_v35, 0.0 }
 0x12d   :  { %105 = vadd.xlane.f32.xlu1 %v104_v36 }
 0x1b6   :  { %v106_v37 = vpop.xlane.xlu1 %105 }
 0x1b7   :  { %v107_v38 = vrot.slane %v106_v37, 4 }
 0x1b9   :  { %v108_v39 = vadd.f32 %v107_v38, %v106_v37 }
 0x1bb   :  { %v109_v40 = vrot.slane %v108_v39, 2 }
 0x1bd   :  { %v110_v41 = vadd.f32 %v109_v40, %v108_v39 }
 0x1bf   :  { %v111_v42 = vrot.slane %v110_v41, 1 }
 0x1c1   :  { %v112_v43 = vadd.f32 %v111_v42, %v110_v41 }
 0x1c3   :  { %133 = vpush %v112_v43 }
 0x1f4   :  { %s134_s28 = spop %133 }
 0x1f5   :  { %v114_v44 = vstv %s134_s28 }
 0x1f6   :  { %116 = vst.msk [vmem:[#allocation7] sm:$0x1] %vm115_vm6, %v114_v44 }
 0x1f7   :  { %192 = shalt.err (!%p189_p0)
}
 0x1f8   :  { %126 = dma.vmem_to_hbm [thread:$0]  %s124_s27, 16, %s256_s4, [#allocation4]  }
 0x1f9   :  { %205 = dma.done.wait [#allocation4], 16  }
 0x1fa   :  { %206 = vsyncadd [#allocation4], 4294967280 }
 0x1fb   :  { %130 = vsyncpa [#allocation3], 1 }
 0x1fc   :  { %131 = vsyncpa [#allocation6], 1 }
 0x1fd   :  { %132 = vsyncpa [#allocation4], 1 }

</bundles_post_ra>
